<compile_context>
chip_gen: v6e
topology: v6e:2x2x1
jax: 0.10.0
libtpu: 0.0.40
codegen_flags: <defaults>
</compile_context>

<pallas_src>
import functools

import jax
import jax.numpy as jnp
from jax.experimental import pallas as pl
from jax.experimental.pallas import tpu as pltpu

# Large-negative mask / init value (finite, so no inf-inf NaN paths).
_NEG_LARGE = float(jnp.finfo(jnp.float32).min)


def _contrastive_head_kernel(pos_ref, neg_ref, out_ref, m_scratch, l_scratch,
                             *, inv_temp, k_total, block_k):
    """One (row_block, k_block) grid step of the fused contrastive loss.

    pos_ref:   (bm, 1)  VMEM   positive similarities (any float dtype)
    neg_ref:   (bm, bk) VMEM   negative similarities (any float dtype)
    out_ref:   (bm, 1)  VMEM   per-row loss (f32), written at the last K step
    m_scratch: (bm, 1)  VMEM f32  running max of scaled logits
    l_scratch: (bm, 1)  VMEM f32  running sum of exp(logit - m)
    """
    k_idx = pl.program_id(1)
    num_k = pl.num_programs(1)

    pos = pos_ref[...].astype(jnp.float32) * inv_temp            # (bm, 1)
    neg = neg_ref[...].astype(jnp.float32) * inv_temp            # (bm, bk)

    # Mask columns past the true K (only needed when K % block_k != 0; static
    # Python branch, so fully aligned shapes pay nothing).
    if k_total % block_k != 0:
        col = (jax.lax.broadcasted_iota(jnp.int32, neg.shape, 1)
               + k_idx * block_k)
        neg = jnp.where(col < k_total, neg, _NEG_LARGE)

    @pl.when(k_idx == 0)
    def _init():
        m_scratch[...] = jnp.full_like(m_scratch, _NEG_LARGE)
        l_scratch[...] = jnp.zeros_like(l_scratch)

    m_prev = m_scratch[...]                                       # (bm, 1)
    l_prev = l_scratch[...]                                       # (bm, 1)

    block_max = jnp.max(neg, axis=-1, keepdims=True)              # (bm, 1)
    # Keep pos in the running max so exp(pos - m) never overflows.
    m_new = jnp.maximum(m_prev, jnp.maximum(pos, block_max))      # (bm, 1)

    correction = jnp.exp(m_prev - m_new)                          # (bm, 1)
    p = jnp.exp(neg - m_new)                                      # (bm, bk)
    l_new = correction * l_prev + jnp.sum(p, axis=-1, keepdims=True)

    m_scratch[...] = m_new
    l_scratch[...] = l_new

    @pl.when(k_idx == num_k - 1)
    def _finalize():
        # Add the single positive term once, then finish the logsumexp.
        l_tot = l_new + jnp.exp(pos - m_new)
        lse = m_new + jnp.log(l_tot)
        out_ref[...] = lse - pos                                  # (bm, 1) f32


def contrastive_head_loss(pos, neg, temperature=0.1, *,
                          block_rows=None, block_k=None):
    """Pallas-backed ContrastiveHead.forward; returns {'loss': scalar f32}."""
    assert pos.ndim == 2 and pos.shape[1] == 1, "pos must be (N, 1)"
    assert neg.ndim == 2 and neg.shape[0] == pos.shape[0], "neg must be (N, K)"
    n, k = neg.shape[0], neg.shape[1]

    # Tile choice: lane-dense K tiles capped at 2048, row tiles capped at 256.
    # f32 worst case: 256*2048*4B * 2 buffers = 4 MiB of VMEM for neg -> fits
    # the default scoped VMEM limit on v5e/v6e and v7x (64 MiB total VMEM).
    if block_rows is None:
        block_rows = n if n <= 256 else 256
    if block_k is None:
        block_k = k if k <= 2048 else 2048

    num_row_blocks = pl.cdiv(n, block_rows)
    num_k_blocks = pl.cdiv(k, block_k)

    kernel = functools.partial(
        _contrastive_head_kernel,
        inv_temp=1.0 / float(temperature),
        k_total=k,
        block_k=block_k)

    itemsize = jnp.dtype(neg.dtype).itemsize
    cost = pl.CostEstimate(
        flops=4 * n * k,                              # scale/sub/max/sum
        transcendentals=n * k + 2 * n * num_k_blocks,  # exp + correction/log
        bytes_accessed=(n * k * itemsize
                        + n * itemsize * num_k_blocks  # pos re-read per K step
                        + n * 4))                      # per-row loss out

    per_row = pl.pallas_call(
        kernel,
        out_shape=jax.ShapeDtypeStruct((n, 1), jnp.float32),
        grid_spec=pltpu.PrefetchScalarGridSpec(
            num_scalar_prefetch=0,
            grid=(num_row_blocks, num_k_blocks),
            in_specs=[
                pl.BlockSpec((block_rows, 1), lambda i, kk: (i, 0)),
                pl.BlockSpec((block_rows, block_k), lambda i, kk: (i, kk)),
            ],
            out_specs=pl.BlockSpec((block_rows, 1), lambda i, kk: (i, 0)),
            scratch_shapes=[
                pltpu.VMEM((block_rows, 1), jnp.float32),  # running max
                pltpu.VMEM((block_rows, 1), jnp.float32),  # running sumexp
            ],
        ),
        compiler_params=pltpu.CompilerParams(
            dimension_semantics=("parallel", "arbitrary")),
        cost_estimate=cost,
    )(pos, neg)

    return {"loss": jnp.mean(per_row)}


def _reference_loss(pos, neg, temperature=0.1):
    """Pure-JAX reference (matches torch.nn.CrossEntropyLoss with label 0)."""
    logits = jnp.concatenate([pos, neg], axis=1).astype(jnp.float32) / temperature
    lse = jax.scipy.special.logsumexp(logits, axis=1)
    return jnp.mean(lse - logits[:, 0])


if __name__ == "__main__":
    key = jax.random.PRNGKey(0)
    k1, k2, k3, k4 = jax.random.split(key, 4)

    # --- Test 1: small shape, single block (module-typical small sizes). ---
    N, K = 8, 32
    pos = jax.random.normal(k1, (N, 1), dtype=jnp.float32)
    neg = jax.random.normal(k2, (N, K), dtype=jnp.float32)
    loss = jax.block_until_ready(
        contrastive_head_loss(pos, neg, temperature=0.1)["loss"])
    ref = jax.block_until_ready(_reference_loss(pos, neg, temperature=0.1))
    assert jnp.allclose(loss, ref, rtol=1e-5, atol=1e-5), (loss, ref)

    # --- Test 2: ragged shape with forced tiny blocks; exercises the row grid,
    # the K-axis online logsumexp, and the edge-block column mask. ---
    N2, K2 = 20, 300
    pos2 = jax.random.normal(k3, (N2, 1), dtype=jnp.float32)
    neg2 = jax.random.normal(k4, (N2, K2), dtype=jnp.float32)
    loss2 = jax.block_until_ready(
        contrastive_head_loss(pos2, neg2, temperature=0.07,
                              block_rows=8, block_k=128)["loss"])
    ref2 = jax.block_until_ready(_reference_loss(pos2, neg2, temperature=0.07))
    assert jnp.allclose(loss2, ref2, rtol=1e-5, atol=1e-5), (loss2, ref2)

    # --- Test 3: bf16 inputs (half the HBM traffic), f32 math in-kernel. ---
    pos_bf = pos2.astype(jnp.bfloat16)
    neg_bf = neg2.astype(jnp.bfloat16)
    loss3 = jax.block_until_ready(
        contrastive_head_loss(pos_bf, neg_bf, temperature=0.1)["loss"])
    ref3 = jax.block_until_ready(_reference_loss(
        pos_bf.astype(jnp.float32), neg_bf.astype(jnp.float32), temperature=0.1))
    assert jnp.allclose(loss3, ref3, rtol=1e-4, atol=1e-4), (loss3, ref3)

    print("KERNEL_OK")
</pallas_src>

<mosaic_0001>
module attributes {stable_mosaic.version = 11 : i64} {
  func.func @_contrastive_head_kernel(%arg0: i32, %arg1: i32, %arg2: memref<8x1xf32, #tpu.memory_space<vmem>>, %arg3: memref<8x32xf32, #tpu.memory_space<vmem>>, %arg4: memref<8x1xf32, #tpu.memory_space<vmem>>, %arg5: memref<8x1xf32, #tpu.memory_space<vmem>>, %arg6: memref<8x1xf32, #tpu.memory_space<vmem>>) attributes {dimension_semantics = [#tpu.dimension_semantics<parallel>, #tpu.dimension_semantics<arbitrary>], iteration_bounds = array<i64: 1, 1>, scalar_prefetch = 0 : i64, scratch_operands = 2 : i64, tpu.core_type = #tpu.core_type<tc>, window_params = [{transform_indices = @transform_0, window_bounds = array<i64: 8, 1>}, {transform_indices = @transform_1, window_bounds = array<i64: 8, 32>}, {transform_indices = @transform_2, window_bounds = array<i64: 8, 1>}]} {
    %c0 = arith.constant 0 : index
    %c0_0 = arith.constant 0 : index
    %0 = vector.load %arg2[%c0, %c0_0] : memref<8x1xf32, #tpu.memory_space<vmem>>, vector<8x1xf32>
    %cst = arith.constant 1.000000e+01 : f32
    %1 = vector.broadcast %cst : f32 to vector<8x1xf32>
    %2 = arith.mulf %0, %1 : vector<8x1xf32>
    %c0_1 = arith.constant 0 : index
    %c0_2 = arith.constant 0 : index
    %3 = vector.load %arg3[%c0_1, %c0_2] : memref<8x32xf32, #tpu.memory_space<vmem>>, vector<8x32xf32>
    %cst_3 = arith.constant 1.000000e+01 : f32
    %4 = vector.broadcast %cst_3 : f32 to vector<8x32xf32>
    %5 = arith.mulf %3, %4 : vector<8x32xf32>
    %c0_i32 = arith.constant 0 : i32
    %6 = arith.cmpi eq, %arg1, %c0_i32 : i32
    %7 = arith.extui %6 : i1 to i32
    %c0_i32_4 = arith.constant 0 : i32
    %8 = arith.cmpi ne, %7, %c0_i32_4 : i32
    scf.if %8 {
      %cst_17 = arith.constant -3.40282347E+38 : f32
      %29 = vector.broadcast %cst_17 : f32 to vector<8x1xf32>
      %c0_18 = arith.constant 0 : index
      %c0_19 = arith.constant 0 : index
      %30 = vector.load %arg5[%c0_18, %c0_19] : memref<8x1xf32, #tpu.memory_space<vmem>>, vector<8x1xf32>
      tpu.vector_store %arg5[%c0_18, %c0_19], %29 {strides = array<i32>} : memref<8x1xf32, #tpu.memory_space<vmem>>, vector<8x1xf32>,
      %cst_20 = arith.constant 0.000000e+00 : f32
      %31 = vector.broadcast %cst_20 : f32 to vector<8x1xf32>
      %c0_21 = arith.constant 0 : index
      %c0_22 = arith.constant 0 : index
      %32 = vector.load %arg6[%c0_21, %c0_22] : memref<8x1xf32, #tpu.memory_space<vmem>>, vector<8x1xf32>
      tpu.vector_store %arg6[%c0_21, %c0_22], %31 {strides = array<i32>} : memref<8x1xf32, #tpu.memory_space<vmem>>, vector<8x1xf32>,
    } else {
    }
    %c0_5 = arith.constant 0 : index
    %c0_6 = arith.constant 0 : index
    %9 = vector.load %arg5[%c0_5, %c0_6] : memref<8x1xf32, #tpu.memory_space<vmem>>, vector<8x1xf32>
    %c0_7 = arith.constant 0 : index
    %c0_8 = arith.constant 0 : index
    %10 = vector.load %arg6[%c0_7, %c0_8] : memref<8x1xf32, #tpu.memory_space<vmem>>, vector<8x1xf32>
    %cst_9 = arith.constant dense<0xFF800000> : vector<8xf32>
    %11 = vector.multi_reduction <maximumf>, %5, %cst_9 [1] : vector<8x32xf32> to vector<8xf32>
    %12 = vector.shape_cast %11 : vector<8xf32> to vector<8x1xf32>
    %13 = arith.maximumf %2, %12 : vector<8x1xf32>
    %14 = arith.maximumf %9, %13 : vector<8x1xf32>
    %15 = arith.subf %9, %14 : vector<8x1xf32>
    %16 = math.exp %15 : vector<8x1xf32>
    %17 = vector.broadcast %14 : vector<8x1xf32> to vector<8x32xf32>
    %18 = arith.subf %5, %17 : vector<8x32xf32>
    %19 = math.exp %18 : vector<8x32xf32>
    %20 = arith.mulf %16, %10 : vector<8x1xf32>
    %cst_10 = arith.constant dense<0.000000e+00> : vector<8xf32>
    %21 = vector.multi_reduction <add>, %19, %cst_10 [1] : vector<8x32xf32> to vector<8xf32>
    %22 = vector.shape_cast %21 : vector<8xf32> to vector<8x1xf32>
    %23 = arith.addf %20, %22 : vector<8x1xf32>
    %c0_11 = arith.constant 0 : index
    %c0_12 = arith.constant 0 : index
    %24 = vector.load %arg5[%c0_11, %c0_12] : memref<8x1xf32, #tpu.memory_space<vmem>>, vector<8x1xf32>
    tpu.vector_store %arg5[%c0_11, %c0_12], %14 {strides = array<i32>} : memref<8x1xf32, #tpu.memory_space<vmem>>, vector<8x1xf32>,
    %c0_13 = arith.constant 0 : index
    %c0_14 = arith.constant 0 : index
    %25 = vector.load %arg6[%c0_13, %c0_14] : memref<8x1xf32, #tpu.memory_space<vmem>>, vector<8x1xf32>
    tpu.vector_store %arg6[%c0_13, %c0_14], %23 {strides = array<i32>} : memref<8x1xf32, #tpu.memory_space<vmem>>, vector<8x1xf32>,
    %c0_i32_15 = arith.constant 0 : i32
    %26 = arith.cmpi eq, %arg1, %c0_i32_15 : i32
    %27 = arith.extui %26 : i1 to i32
    %c0_i32_16 = arith.constant 0 : i32
    %28 = arith.cmpi ne, %27, %c0_i32_16 : i32
    scf.if %28 {
      %29 = arith.subf %2, %14 : vector<8x1xf32>
      %30 = math.exp %29 : vector<8x1xf32>
      %31 = arith.addf %23, %30 : vector<8x1xf32>
      %32 = math.log %31 : vector<8x1xf32>
      %33 = arith.addf %14, %32 : vector<8x1xf32>
      %34 = arith.subf %33, %2 : vector<8x1xf32>
      %c0_17 = arith.constant 0 : index
      %c0_18 = arith.constant 0 : index
      %35 = vector.load %arg4[%c0_17, %c0_18] : memref<8x1xf32, #tpu.memory_space<vmem>>, vector<8x1xf32>
      tpu.vector_store %arg4[%c0_17, %c0_18], %34 {strides = array<i32>} : memref<8x1xf32, #tpu.memory_space<vmem>>, vector<8x1xf32>,
    } else {
    }
    return
  }
  func.func @transform_0(%arg0: i32, %arg1: i32) -> (i32, i32) {
    %c0_i32 = arith.constant 0 : i32
    %c0_i32_0 = arith.constant 0 : i32
    return %arg0, %c0_i32 : i32, i32
  }
  func.func @transform_1(%arg0: i32, %arg1: i32) -> (i32, i32) {
    %c0_i32 = arith.constant 0 : i32
    return %arg0, %arg1 : i32, i32
  }
  func.func @transform_2(%arg0: i32, %arg1: i32) -> (i32, i32) {
    %c0_i32 = arith.constant 0 : i32
    %c0_i32_0 = arith.constant 0 : i32
    return %arg0, %c0_i32 : i32, i32
  }
}

</mosaic_0001>

<bundles_post_ra>
// kernel: tpu_custom_call.1
= control target key start
LH: loop header
LB: loop body
LE: loop exit
PB: predicated region body
PF: predicated region fallthrough
CT: control target
= control target key end

     0   :  { %vm19_vm0 = vcmask 7168   ;;  %vm24_vm1 = vcmask 261120   ;;  %v77_v1 = vmov -3.4028235e+38   ;;  %v78_v4 = vmov 0   ;;  %s111_s1 = inlined_call_operand.vmem [shape: f32[8,32], index: 1, kind: input, shape index: {}]   ;;  %s112_s0 = inlined_call_operand.vmem [shape: f32[8,1], index: 0, kind: input, shape index: {}]   ;;  %s113_s2 = inlined_call_operand.vmem [shape: f32[8,1], index: 2, kind: output, shape index: {}]  }
   0x1   :  { %v13_v0 = vld [vmem:[%s111_s1] sm:$0xff]  ;;  %20 = vst.msk [vmem:[#allocation2] sm:$0xff] %vm19_vm0, %v77_v1  ;;  %68 = vset.pattern.permute.xlu0 %v78_v4  ;;  %v79_v5 = vmov 0.0  }
   0x2   :  { %v14_v2 = vmul.f32 10.0, %v13_v0  ;;  %21 = vst.msk [vmem:[#allocation3] sm:$0xff] %vm19_vm0, %v79_v5  ;;  %v11_v6 = vld [vmem:[%s112_s0] sm:$0xff] }
   0x3   :  { %v12_v7 = vmul.f32 10.0, %v11_v6 }
   0x4   :  { %v25_v3 = vsel %vm24_vm1, %v14_v2, -inf }
   0x5   :  { %26 = vmax.xlane.f32.xlu0 %v25_v3 }
   0x8   :  { %v22_v8 = vld [vmem:[#allocation2] sm:$0xff] }
   0x9   :  { %v23_v22 = vld [vmem:[#allocation3] sm:$0xff] }
  0x8e   :  { %v27_v9 = vpop.xlane.xlu0 %26 }
  0x8f   :  { %v28_v10 = vmax.f32 %v12_v7, %v27_v9 }
  0x91   :  { %v29_v11 = vmax.f32 %v22_v8, %v28_v10 }
  0x93   :  { %47 = vst.msk [vmem:[#allocation2] sm:$0xff] %vm19_vm0, %v29_v11  ;;  %35 = vperm.xlu0 %68, %v29_v11   ;;  %v30_v17 = vsub.f32 %v22_v8, %v29_v11  ;;  %v52_v19 = vsub.f32 %v12_v7, %v29_v11 }
  0x95   :  { %v31_v18 = vmul.f32 1.442695, %v30_v17  ;;  %v53_v20 = vmul.f32 1.442695, %v52_v19 }
 0x10e   :  { %v36_v12 = vpop.permute.xlu0 %35 }
 0x10f   :  { %v38_v13 = vsub.f32 %v14_v2, %v36_v12 }
 0x111   :  { %v39_v14 = vmul.f32 1.442695, %v38_v13 }
 0x113   :  { %69 = vpow2.f32 %v39_v14 }
 0x114   :  { %71 = vpow2.f32 %v31_v18 }
 0x115   :  { %73 = vpow2.f32 %v53_v20 }
 0x120   :  { %v70_v15 = vpop.eup %69 }
 0x121   :  { %v42_v16 = vsel %vm24_vm1, %v70_v15, 0.0  ;;  %v72_v21 = vpop.eup %71 }
 0x122   :  { %43 = vadd.xlane.f32.xlu1 %v42_v16  ;;  %v41_v23 = vmul.f32 %v72_v21, %v23_v22  ;;  %v74_v26 = vpop.eup %73 }
 0x1ab   :  { %v44_v24 = vpop.xlane.xlu1 %43 }
 0x1ac   :  { %v45_v25 = vadd.f32 %v44_v24, %v41_v23 }
 0x1ae   :  { %48 = vst.msk [vmem:[#allocation3] sm:$0xff] %vm19_vm0, %v45_v25  ;;  %v55_v27 = vadd.f32 %v74_v26, %v45_v25 }
 0x1b0   :  { %75 = vlog2.f32 %v55_v27 }
 0x1bd   :  { %v76_v28 = vpop.eup %75 }
 0x1be   :  { %v57_v29 = vmul.f32 0.6931472, %v76_v28 }
 0x1c0   :  { %v58_v30 = vadd.f32 %v57_v29, %v29_v11 }
 0x1c2   :  { %v59_v31 = vsub.f32 %v58_v30, %v12_v7 }
 0x1c4   :  { %60 = vst.msk [vmem:[%s113_s2] sm:$0xff] %vm19_vm0, %v59_v31 }

</bundles_post_ra>
